<compile_context>
chip_gen: v5e
topology: v5e:2x2
jax: 0.10.0
libtpu: 0.0.40
codegen_flags: <defaults>
</compile_context>

<pallas_src>
import functools

import jax
import jax.numpy as jnp
from jax import lax
from jax.experimental import pallas as pl
from jax.experimental.pallas import tpu as pltpu

LANES = 128
SUBLANES = 8
TARGET_TILE_BYTES = 2 * 1024 * 1024      # per input, per pipeline buffer
VMEM_LIMIT_BYTES = 32 * 1024 * 1024      # 3 inputs x 2 bufs x 2 MiB + headroom


def _round_up(x, m):
    return (x + m - 1) // m * m


def _choose_tiles(P, R, C):
    """Pick (tile_p, tile_r) so one padded input tile is ~TARGET_TILE_BYTES."""
    padded_row_bytes = _round_up(max(C, 1), LANES) * 4          # f32-equivalent
    slab_bytes = _round_up(max(R, 1), SUBLANES) * padded_row_bytes
    if slab_bytes <= TARGET_TILE_BYTES:
        tile_r = R
        tile_p = min(max(1, TARGET_TILE_BYTES // slab_bytes), P)
    else:
        tile_p = 1
        tile_r = max(SUBLANES,
                     (TARGET_TILE_BYTES // padded_row_bytes)
                     // SUBLANES * SUBLANES)
        if tile_r >= R:
            tile_r = R
    return tile_p, tile_r


def _sem_con_loss_kernel(h_ref, w_ref, s_ref, o_ref, *,
                         P, R, tile_p, tile_r, p_blocks, r_blocks,
                         p_partial, r_partial):
    p = pl.program_id(0)
    r = pl.program_id(1)

    @pl.when(jnp.logical_and(p == 0, r == 0))
    def _():
        o_ref[...] = jnp.zeros_like(o_ref)

    h = h_ref[...].astype(jnp.float32)
    w = w_ref[...].astype(jnp.float32)
    s = s_ref[...].astype(jnp.float32)
    d = h - s
    term = w * jnp.abs(s) * d * d            # (tile_p, tile_r, C), pure VPU

    if not (p_partial or r_partial):
        # Every block is full: single unmasked accumulate path.
        o_ref[...] += term.sum(axis=0)       # elementwise vreg adds only
    else:
        conds = []
        if p_partial:
            conds.append(p == p_blocks - 1)
        if r_partial:
            conds.append(r == r_blocks - 1)
        is_edge = conds[0]
        for c in conds[1:]:
            is_edge = jnp.logical_or(is_edge, c)

        @pl.when(jnp.logical_not(is_edge))
        def _():
            o_ref[...] += term.sum(axis=0)

        @pl.when(is_edge)
        def _():
            # Pallas pads partial blocks with undefined data; discard it with
            # a select (NOT a multiplicative scale) so NaN/Inf garbage never
            # reaches the accumulator.
            mask = None
            if p_partial:
                p_ids = p * tile_p + lax.broadcasted_iota(
                    jnp.int32, term.shape, 0)
                mask = p_ids < P
            if r_partial:
                r_ids = r * tile_r + lax.broadcasted_iota(
                    jnp.int32, term.shape, 1)
                rm = r_ids < R
                mask = rm if mask is None else jnp.logical_and(mask, rm)
            o_ref[...] += jnp.where(mask, term, 0.0).sum(axis=0)


@jax.jit
def sem_con_loss(H, W, S):
    """loss = sum(W * |S| * (H - S)**2) / H.shape[0]**2"""
    assert H.shape == W.shape == S.shape, "H, W, S must share a shape"
    batch = H.shape[0] if H.ndim >= 1 else 1

    # Collapse the leading dims only; the last two dims (and thus the TPU
    # tiled layout) are preserved, so these reshapes are free and the kernel
    # reads each input from HBM exactly once.
    if H.ndim >= 3:
        R, C = H.shape[-2], H.shape[-1]
        P = 1
        for d in H.shape[:-2]:
            P *= d
    elif H.ndim == 2:
        P, (R, C) = 1, H.shape
    elif H.ndim == 1:
        P, R, C = 1, 1, H.shape[0]
    else:
        P, R, C = 1, 1, 1

    h3 = H.reshape(P, R, C)
    w3 = W.reshape(P, R, C)
    s3 = S.reshape(P, R, C)

    tile_p, tile_r = _choose_tiles(P, R, C)
    p_blocks = pl.cdiv(P, tile_p)
    r_blocks = pl.cdiv(R, tile_r)
    p_partial = (p_blocks * tile_p != P)
    r_partial = (r_blocks * tile_r != R)

    in_spec = pl.BlockSpec((tile_p, tile_r, C), lambda p, r: (p, r, 0))
    out_spec = pl.BlockSpec((tile_r, C), lambda p, r: (0, 0))

    n = P * R * C
    in_bytes = n * (jnp.dtype(H.dtype).itemsize
                    + jnp.dtype(W.dtype).itemsize
                    + jnp.dtype(S.dtype).itemsize)
    cost = pl.CostEstimate(flops=6 * n, transcendentals=0,
                           bytes_accessed=in_bytes + 4 * tile_r * C)

    partial = pl.pallas_call(
        functools.partial(
            _sem_con_loss_kernel,
            P=P, R=R, tile_p=tile_p, tile_r=tile_r,
            p_blocks=p_blocks, r_blocks=r_blocks,
            p_partial=p_partial, r_partial=r_partial),
        out_shape=jax.ShapeDtypeStruct((tile_r, C), jnp.float32),
        grid_spec=pltpu.PrefetchScalarGridSpec(
            num_scalar_prefetch=0,
            grid=(p_blocks, r_blocks),
            in_specs=[in_spec, in_spec, in_spec],
            out_specs=out_spec,
        ),
        compiler_params=pltpu.CompilerParams(
            dimension_semantics=("arbitrary", "arbitrary"),
            vmem_limit_bytes=VMEM_LIMIT_BYTES),
        cost_estimate=cost,
    )(h3, w3, s3)

    # Tiny final cross-lane reduction (tile_r x C elements) in plain XLA.
    return jnp.sum(partial) / jnp.float32(batch * batch)


if __name__ == "__main__":
    key = jax.random.PRNGKey(0)
    kh, kw, ks = jax.random.split(key, 3)

    # NCHW, small shapes.
    shape = (2, 4, 16, 16)
    H = jax.random.normal(kh, shape, dtype=jnp.float32)
    W = jax.random.uniform(kw, shape, dtype=jnp.float32)
    S = jax.random.normal(ks, shape, dtype=jnp.float32)

    loss = sem_con_loss(H, W, S)
    jax.block_until_ready(loss)

    # Pure-JAX reference check.
    ref = jnp.sum(W * jnp.abs(S) * (H - S) ** 2) / shape[0] ** 2
    assert jnp.allclose(loss, ref, rtol=1e-5, atol=1e-5), (loss, ref)

    print("KERNEL_OK")
</pallas_src>

<mosaic_0001>
module attributes {stable_mosaic.version = 11 : i64} {
  func.func @_sem_con_loss_kernel(%arg0: i32, %arg1: i32, %arg2: memref<8x16x16xf32, #tpu.memory_space<vmem>>, %arg3: memref<8x16x16xf32, #tpu.memory_space<vmem>>, %arg4: memref<8x16x16xf32, #tpu.memory_space<vmem>>, %arg5: memref<16x16xf32, #tpu.memory_space<vmem>>) attributes {dimension_semantics = [#tpu.dimension_semantics<arbitrary>, #tpu.dimension_semantics<arbitrary>], iteration_bounds = array<i64: 1, 1>, scalar_prefetch = 0 : i64, scratch_operands = 0 : i64, tpu.core_type = #tpu.core_type<tc>, window_params = [{transform_indices = @transform_0, window_bounds = array<i64: 8, 16, 16>}, {transform_indices = @transform_1, window_bounds = array<i64: 8, 16, 16>}, {transform_indices = @transform_2, window_bounds = array<i64: 8, 16, 16>}, {pipeline_mode = #tpu.pipeline_mode<synchronous>, transform_indices = @transform_3, window_bounds = array<i64: 16, 16>}]} {
    %c0_i32 = arith.constant 0 : i32
    %0 = arith.cmpi eq, %arg0, %c0_i32 : i32
    %c0_i32_0 = arith.constant 0 : i32
    %1 = arith.cmpi eq, %arg1, %c0_i32_0 : i32
    %2 = arith.andi %0, %1 : i1
    %3 = arith.extui %2 : i1 to i32
    %c0_i32_1 = arith.constant 0 : i32
    %4 = arith.cmpi ne, %3, %c0_i32_1 : i32
    scf.if %4 {
      %cst_14 = arith.constant 0.000000e+00 : f32
      %17 = vector.broadcast %cst_14 : f32 to vector<16x16xf32>
      %c0_15 = arith.constant 0 : index
      %c0_16 = arith.constant 0 : index
      %18 = vector.load %arg5[%c0_15, %c0_16] : memref<16x16xf32, #tpu.memory_space<vmem>>, vector<16x16xf32>
      tpu.vector_store %arg5[%c0_15, %c0_16], %17 {strides = array<i32>} : memref<16x16xf32, #tpu.memory_space<vmem>>, vector<16x16xf32>,
    } else {
    }
    %c0 = arith.constant 0 : index
    %c0_2 = arith.constant 0 : index
    %c0_3 = arith.constant 0 : index
    %5 = vector.load %arg2[%c0, %c0_2, %c0_3] : memref<8x16x16xf32, #tpu.memory_space<vmem>>, vector<8x16x16xf32>
    %c0_4 = arith.constant 0 : index
    %c0_5 = arith.constant 0 : index
    %c0_6 = arith.constant 0 : index
    %6 = vector.load %arg3[%c0_4, %c0_5, %c0_6] : memref<8x16x16xf32, #tpu.memory_space<vmem>>, vector<8x16x16xf32>
    %c0_7 = arith.constant 0 : index
    %c0_8 = arith.constant 0 : index
    %c0_9 = arith.constant 0 : index
    %7 = vector.load %arg4[%c0_7, %c0_8, %c0_9] : memref<8x16x16xf32, #tpu.memory_space<vmem>>, vector<8x16x16xf32>
    %8 = arith.subf %5, %7 : vector<8x16x16xf32>
    %9 = math.absf %7 : vector<8x16x16xf32>
    %10 = arith.mulf %6, %9 : vector<8x16x16xf32>
    %11 = arith.mulf %10, %8 : vector<8x16x16xf32>
    %12 = arith.mulf %11, %8 : vector<8x16x16xf32>
    %c0_10 = arith.constant 0 : index
    %c0_11 = arith.constant 0 : index
    %13 = vector.load %arg5[%c0_10, %c0_11] : memref<16x16xf32, #tpu.memory_space<vmem>>, vector<16x16xf32>
    %cst = arith.constant dense<0.000000e+00> : vector<16x16xf32>
    %14 = vector.multi_reduction <add>, %12, %cst [0] : vector<8x16x16xf32> to vector<16x16xf32>
    %15 = arith.addf %13, %14 : vector<16x16xf32>
    %c0_12 = arith.constant 0 : index
    %c0_13 = arith.constant 0 : index
    %16 = vector.load %arg5[%c0_12, %c0_13] : memref<16x16xf32, #tpu.memory_space<vmem>>, vector<16x16xf32>
    tpu.vector_store %arg5[%c0_12, %c0_13], %15 {strides = array<i32>} : memref<16x16xf32, #tpu.memory_space<vmem>>, vector<16x16xf32>,
    return
  }
  func.func @transform_0(%arg0: i32, %arg1: i32) -> (i32, i32, i32) {
    %c0_i32 = arith.constant 0 : i32
    %c0_i32_0 = arith.constant 0 : i32
    return %arg0, %arg1, %c0_i32 : i32, i32, i32
  }
  func.func @transform_1(%arg0: i32, %arg1: i32) -> (i32, i32, i32) {
    %c0_i32 = arith.constant 0 : i32
    %c0_i32_0 = arith.constant 0 : i32
    return %arg0, %arg1, %c0_i32 : i32, i32, i32
  }
  func.func @transform_2(%arg0: i32, %arg1: i32) -> (i32, i32, i32) {
    %c0_i32 = arith.constant 0 : i32
    %c0_i32_0 = arith.constant 0 : i32
    return %arg0, %arg1, %c0_i32 : i32, i32, i32
  }
  func.func @transform_3(%arg0: i32, %arg1: i32) -> (i32, i32) {
    %c0_i32 = arith.constant 0 : i32
    %c0_i32_0 = arith.constant 0 : i32
    %c0_i32_1 = arith.constant 0 : i32
    return %c0_i32, %c0_i32_0 : i32, i32
  }
}

</mosaic_0001>

<bundles_post_ra>
// kernel: sem_con_loss.1
= control target key start
LH: loop header
LB: loop body
LE: loop exit
PB: predicated region body
PF: predicated region fallthrough
CT: control target
= control target key end

     0   :  { %8 = vsyncpa [#allocation3], 0  ;;  %s396_s0 = inlined_call_operand.hbm [shape: f32[8,16,16], index: 0, kind: input, shape index: {}]   ;;  %s397_s1 = inlined_call_operand.hbm [shape: f32[8,16,16], index: 1, kind: input, shape index: {}]   ;;  %s398_s2 = inlined_call_operand.hbm [shape: f32[8,16,16], index: 2, kind: input, shape index: {}]   ;;  %s399_s3 = inlined_call_operand.vmem [shape: f32[16,16], index: 3, kind: output, shape index: {}]  }
   0x1   :  { %9 = vsyncpa [#allocation5], 0  ;;  %s27_s14 = sshll.u32 %s397_s1, 4  ;;  %s323_s15 = smov [#allocation4]   ;;  %s28_s14 = int_to_ptr.hbm [resolvable:$true] %s27_s14 }
   0x2   :  { %s29_s16 = sshll.u32 %s323_s15, 4  ;;  %s14_s19 = sshll.u32 %s396_s0, 4  ;;  %s30_s16 = int_to_ptr.vmem [resolvable:$true] %s29_s16  ;;  %s15_s19 = int_to_ptr.hbm [resolvable:$true] %s14_s19 }
   0x3   :  { %s324_s20 = smov 128   ;;  %s325_s21 = smov 8  }
   0x4   :  { %35 = dma.hbm_to_vmem [thread:$0]  %s28_s14, 2048, %s30_s16, [#allocation5], %s324_s20, %s324_s20, %s325_s21  }
   0x5   :  { %s326_s22 = smov [#allocation2]   ;;  %s40_s26 = sshll.u32 %s398_s2, 4  ;;  %s41_s26 = int_to_ptr.hbm [resolvable:$true] %s40_s26 }
   0x6   :  { %s16_s23 = sshll.u32 %s326_s22, 4  ;;  %s327_s1 = smov [#allocation6]   ;;  %s17_s23 = int_to_ptr.vmem [resolvable:$true] %s16_s23 }
   0x7   :  { %22 = dma.hbm_to_vmem [thread:$0]  %s15_s19, 2048, %s17_s23, [#allocation3], %s324_s20, %s324_s20, %s325_s21  }
   0x8   :  { %s42_s27 = sshll.u32 %s327_s1, 4  ;;  %s43_s27 = int_to_ptr.vmem [resolvable:$true] %s42_s27 }
   0x9   :  { %48 = dma.hbm_to_vmem [thread:$0]  %s41_s26, 2048, %s43_s27, [#allocation5], %s324_s20, %s324_s20, %s325_s21  }
   0xa   :  { %319 = dma.done.wait [#allocation3], 2048  }
   0xb   :  { %320 = vsyncadd [#allocation3], 4294965248 }
   0xc   :  { %321 = dma.done.wait [#allocation5], 4096  }
   0xd   :  { %322 = vsyncadd [#allocation5], 4294963200  ;;  %vm67_vm0 = vcmask 130048   ;;  %v328_v0 = vmov 0.0   ;;  %v70_v1 = vld [vmem:[#allocation2] sm:$0xff]  ;;  %v72_v2 = vld [vmem:[#allocation2 + $0x10] sm:$0xff] }
   0xe   :  { %68 = vst.msk [vmem:[%s399_s3] sm:$0xff] %vm67_vm0, %v328_v0  ;;  %v74_v3 = vld [vmem:[#allocation2 + $0x20] sm:$0xff]  ;;  %v76_v4 = vld [vmem:[#allocation2 + $0x30] sm:$0xff] }
   0xf   :  { %69 = vst.msk [vmem:[%s399_s3 + $0x8] sm:$0xff] %vm67_vm0, %v328_v0  ;;  %v78_v5 = vld [vmem:[#allocation2 + $0x40] sm:$0xff]  ;;  %v80_v6 = vld [vmem:[#allocation2 + $0x50] sm:$0xff]  ;;  %v71_v0 = vld [vmem:[#allocation2 + $0x8] sm:$0xff] }
  0x10   :  { %v82_v7 = vld [vmem:[#allocation2 + $0x60] sm:$0xff]  ;;  %v84_v8 = vld [vmem:[#allocation2 + $0x70] sm:$0xff] }
  0x11   :  { %v86_v9 = vld [vmem:[#allocation4] sm:$0xff]  ;;  %v88_v10 = vld [vmem:[#allocation4 + $0x10] sm:$0xff] }
  0x12   :  { %v90_v11 = vld [vmem:[#allocation4 + $0x20] sm:$0xff]  ;;  %v104_v13 = vld [vmem:[#allocation6 + $0x10] sm:$0xff] }
  0x13   :  { %v102_v12 = vld [vmem:[#allocation6] sm:$0xff]  ;;  %v92_v14 = vld [vmem:[#allocation4 + $0x30] sm:$0xff]  ;;  %v120_v20 = vsub.f32 %v72_v2, %v104_v13  ;;  %v136_v28 = vand.u32 2147483647, %v104_v13  ;;  %v75_v2 = vld [vmem:[#allocation2 + $0x28] sm:$0xff] }
  0x14   :  { %v94_v15 = vld [vmem:[#allocation4 + $0x40] sm:$0xff]  ;;  %v108_v17 = vld [vmem:[#allocation6 + $0x30] sm:$0xff]  ;;  %v118_v19 = vsub.f32 %v70_v1, %v102_v12  ;;  %v134_v21 = vand.u32 2147483647, %v102_v12  ;;  %v73_v1 = vld [vmem:[#allocation2 + $0x18] sm:$0xff] }
  0x15   :  { %v106_v16 = vld [vmem:[#allocation6 + $0x20] sm:$0xff]  ;;  %v112_v22 = vld [vmem:[#allocation6 + $0x50] sm:$0xff]  ;;  %v124_v26 = vsub.f32 %v76_v4, %v108_v17  ;;  %v140_v36 = vand.u32 2147483647, %v108_v17  ;;  %v152_v42 = vmul.f32 %v136_v28, %v88_v10  ;;  %v103_v12 = vld [vmem:[#allocation6 + $0x8] sm:$0xff] }
  0x16   :  { %v110_v18 = vld [vmem:[#allocation6 + $0x40] sm:$0xff]  ;;  %v116_v24 = vld [vmem:[#allocation6 + $0x70] sm:$0xff]  ;;  %v122_v25 = vsub.f32 %v74_v3, %v106_v16  ;;  %v128_v32 = vsub.f32 %v80_v6, %v112_v22  ;;  %v138_v35 = vand.u32 2147483647, %v106_v16  ;;  %v144_v38 = vand.u32 2147483647, %v112_v22 }
  0x17   :  { %v114_v23 = vld [vmem:[#allocation6 + $0x60] sm:$0xff]  ;;  %v126_v27 = vsub.f32 %v78_v5, %v110_v18  ;;  %v96_v29 = vld [vmem:[#allocation4 + $0x50] sm:$0xff]  ;;  %v132_v34 = vsub.f32 %v84_v8, %v116_v24  ;;  %v142_v37 = vand.u32 2147483647, %v110_v18  ;;  %v150_v39 = vmul.f32 %v134_v21, %v86_v9  ;;  %v77_v6 = vld [vmem:[#allocation2 + $0x38] sm:$0xff] }
  0x18   :  { %v98_v30 = vld [vmem:[#allocation4 + $0x60] sm:$0xff]  ;;  %v100_v31 = vld [vmem:[#allocation4 + $0x70] sm:$0xff]  ;;  %v130_v33 = vsub.f32 %v82_v7, %v114_v23  ;;  %v146_v40 = vand.u32 2147483647, %v114_v23  ;;  %v148_v41 = vand.u32 2147483647, %v116_v24  ;;  %v154_v43 = vmul.f32 %v138_v35, %v90_v11 }
  0x19   :  { %v156_v44 = vmul.f32 %v140_v36, %v92_v14  ;;  %v158_v45 = vmul.f32 %v142_v37, %v94_v15  ;;  %v160_v46 = vmul.f32 %v144_v38, %v96_v29  ;;  %v166_v47 = vmul.f32 %v150_v39, %v118_v19  ;;  %v79_v7 = vld [vmem:[#allocation2 + $0x48] sm:$0xff]  ;;  %v81_v8 = vld [vmem:[#allocation2 + $0x58] sm:$0xff] }
  0x1a   :  { %v162_v48 = vmul.f32 %v146_v40, %v98_v30  ;;  %v164_v49 = vmul.f32 %v148_v41, %v100_v31  ;;  %v168_v50 = vmul.f32 %v152_v42, %v120_v20  ;;  %v170_v51 = vmul.f32 %v154_v43, %v122_v25  ;;  %v87_v11 = vld [vmem:[#allocation4 + $0x8] sm:$0xff]  ;;  %v105_v13 = vld [vmem:[#allocation6 + $0x18] sm:$0xff] }
  0x1b   :  { %v172_v52 = vmul.f32 %v156_v44, %v124_v26  ;;  %v174_v53 = vmul.f32 %v158_v45, %v126_v27  ;;  %v176_v54 = vmul.f32 %v160_v46, %v128_v32  ;;  %v182_v55 = vmul.f32 %v166_v47, %v118_v19  ;;  %v89_v18 = vld [vmem:[#allocation4 + $0x18] sm:$0xff]  ;;  %v91_v19 = vld [vmem:[#allocation4 + $0x28] sm:$0xff] }
  0x1c   :  { %v178_v56 = vmul.f32 %v162_v48, %v130_v33  ;;  %v180_v57 = vmul.f32 %v164_v49, %v132_v34  ;;  %v184_v58 = vmul.f32 %v168_v50, %v120_v20  ;;  %v186_v59 = vmul.f32 %v170_v51, %v122_v25  ;;  %v107_v20 = vld [vmem:[#allocation6 + $0x28] sm:$0xff]  ;;  %v109_v21 = vld [vmem:[#allocation6 + $0x38] sm:$0xff] }
  0x1d   :  { %v188_v60 = vmul.f32 %v172_v52, %v124_v26  ;;  %v190_v61 = vmul.f32 %v174_v53, %v126_v27  ;;  %v192_v62 = vmul.f32 %v176_v54, %v128_v32  ;;  %v201_v63 = vsel %vm67_vm0, %v182_v55, 0.0  ;;  %v83_v23 = vld [vmem:[#allocation2 + $0x68] sm:$0xff]  ;;  %v93_v24 = vld [vmem:[#allocation4 + $0x38] sm:$0xff] }
  0x1e   :  { %v194_v3 = vmul.f32 %v178_v56, %v130_v33  ;;  %v202_v4 = vsel %vm67_vm0, %v184_v58, 0.0  ;;  %v204_v5 = vsel %vm67_vm0, %v186_v59, 0.0  ;;  %v196_v9 = vmul.f32 %v180_v57, %v132_v34  ;;  %v95_v25 = vld [vmem:[#allocation4 + $0x48] sm:$0xff]  ;;  %v113_v27 = vld [vmem:[#allocation6 + $0x58] sm:$0xff] }
  0x1f   :  { %v203_v10 = vadd.f32 %v202_v4, %v201_v63  ;;  %v206_v14 = vsel %vm67_vm0, %v188_v60, 0.0  ;;  %v208_v15 = vsel %vm67_vm0, %v190_v61, 0.0  ;;  %v210_v16 = vsel %vm67_vm0, %v192_v62, 0.0  ;;  %v111_v26 = vld [vmem:[#allocation6 + $0x48] sm:$0xff]  ;;  %v97_v32 = vld [vmem:[#allocation4 + $0x58] sm:$0xff] }
  0x20   :  { %v212_v17 = vsel %vm67_vm0, %v194_v3, 0.0  ;;  %v115_v28 = vld [vmem:[#allocation6 + $0x68] sm:$0xff]  ;;  %v119_v29 = vsub.f32 %v71_v0, %v103_v12  ;;  %v121_v30 = vsub.f32 %v73_v1, %v105_v13  ;;  %v123_v31 = vsub.f32 %v75_v2, %v107_v20  ;;  %v117_v34 = vld [vmem:[#allocation6 + $0x78] sm:$0xff] }
  0x21   :  { %v205_v22 = vadd.f32 %v204_v5, %v203_v10  ;;  %v99_v33 = vld [vmem:[#allocation4 + $0x68] sm:$0xff]  ;;  %v125_v35 = vsub.f32 %v77_v6, %v109_v21  ;;  %v127_v36 = vsub.f32 %v79_v7, %v111_v26  ;;  %v129_v37 = vsub.f32 %v81_v8, %v113_v27  ;;  %v85_v51 = vld [vmem:[#allocation2 + $0x78] sm:$0xff]  ;;  %v198_v5 = vld [vmem:[%s399_s3] sm:$0xff] }
  0x22   :  { %v135_v38 = vand.u32 2147483647, %v103_v12  ;;  %v137_v40 = vand.u32 2147483647, %v105_v13  ;;  %v139_v41 = vand.u32 2147483647, %v107_v20  ;;  %v131_v53 = vsub.f32 %v83_v23, %v115_v28 }
  0x23   :  { %v207_v39 = vadd.f32 %v206_v14, %v205_v22  ;;  %v141_v42 = vand.u32 2147483647, %v109_v21  ;;  %v143_v43 = vand.u32 2147483647, %v111_v26  ;;  %v145_v44 = vand.u32 2147483647, %v113_v27 }
  0x24   :  { %v147_v45 = vand.u32 2147483647, %v115_v28  ;;  %v151_v46 = vmul.f32 %v135_v38, %v87_v11  ;;  %v149_v48 = vand.u32 2147483647, %v117_v34  ;;  %v153_v49 = vmul.f32 %v137_v40, %v89_v18  ;;  %v101_v52 = vld [vmem:[#allocation4 + $0x78] sm:$0xff] }
  0x25   :  { %v209_v47 = vadd.f32 %v208_v15, %v207_v39  ;;  %v155_v50 = vmul.f32 %v139_v41, %v91_v19  ;;  %v157_v54 = vmul.f32 %v141_v42, %v93_v24  ;;  %v159_v55 = vmul.f32 %v143_v43, %v95_v25 }
  0x26   :  { %v161_v56 = vmul.f32 %v145_v44, %v97_v32  ;;  %v163_v58 = vmul.f32 %v147_v45, %v99_v33  ;;  %v167_v59 = vmul.f32 %v151_v46, %v119_v29  ;;  %v169_v60 = vmul.f32 %v153_v49, %v121_v30  ;;  %v199_v32 = vld [vmem:[%s399_s3 + $0x8] sm:$0xff] }
  0x27   :  { %v211_v57 = vadd.f32 %v210_v16, %v209_v47  ;;  %v214_v61 = vsel %vm67_vm0, %v196_v9, 0.0  ;;  %v171_v62 = vmul.f32 %v155_v50, %v123_v31  ;;  %v173_v63 = vmul.f32 %v157_v54, %v125_v35 }
  0x28   :  { %v175_v0 = vmul.f32 %v159_v55, %v127_v36  ;;  %v133_v2 = vsub.f32 %v85_v51, %v117_v34  ;;  %v165_v3 = vmul.f32 %v149_v48, %v101_v52  ;;  %v183_v4 = vmul.f32 %v167_v59, %v119_v29 }
  0x29   :  { %v213_v1 = vadd.f32 %v212_v17, %v211_v57  ;;  %v177_v6 = vmul.f32 %v161_v56, %v129_v37  ;;  %v185_v7 = vmul.f32 %v169_v60, %v121_v30  ;;  %v187_v8 = vmul.f32 %v171_v62, %v123_v31 }
  0x2a   :  { %v189_v10 = vmul.f32 %v173_v63, %v125_v35  ;;  %v179_v12 = vmul.f32 %v163_v58, %v131_v53  ;;  %v191_v13 = vmul.f32 %v175_v0, %v127_v36  ;;  %v216_v9 = vsel %vm67_vm0, %v183_v4, 0.0 }
  0x2b   :  { %v215_v11 = vadd.f32 %v214_v61, %v213_v1  ;;  %v217_v14 = vsel %vm67_vm0, %v185_v7, 0.0  ;;  %v219_v15 = vsel %vm67_vm0, %v187_v8, 0.0  ;;  %v181_v18 = vmul.f32 %v165_v3, %v133_v2 }
  0x2c   :  { %v218_v17 = vadd.f32 %v217_v14, %v216_v9  ;;  %v193_v19 = vmul.f32 %v177_v6, %v129_v37  ;;  %v221_v20 = vsel %vm67_vm0, %v189_v10, 0.0  ;;  %v195_v22 = vmul.f32 %v179_v12, %v131_v53 }
  0x2d   :  { %v231_v16 = vadd.f32 %v215_v11, %v198_v5  ;;  %v223_v23 = vsel %vm67_vm0, %v191_v13, 0.0  ;;  %v197_v25 = vmul.f32 %v181_v18, %v133_v2 }
  0x2e   :  { %v220_v21 = vadd.f32 %v219_v15, %v218_v17  ;;  %v225_v26 = vsel %vm67_vm0, %v193_v19, 0.0  ;;  %v227_v28 = vsel %vm67_vm0, %v195_v22, 0.0 }
  0x2f   :  { %233 = vst.msk [vmem:[%s399_s3] sm:$0xff] %vm67_vm0, %v231_v16  ;;  %v229_v30 = vsel %vm67_vm0, %v197_v25, 0.0 }
  0x30   :  { %v222_v24 = vadd.f32 %v221_v20, %v220_v21 }
  0x32   :  { %v224_v27 = vadd.f32 %v223_v23, %v222_v24 }
  0x34   :  { %v226_v29 = vadd.f32 %v225_v26, %v224_v27 }
  0x36   :  { %v228_v31 = vadd.f32 %v227_v28, %v226_v29 }
  0x38   :  { %v230_v33 = vadd.f32 %v229_v30, %v228_v31 }
  0x3a   :  { %v232_v34 = vadd.f32 %v230_v33, %v199_v32 }
  0x3c   :  { %234 = vst.msk [vmem:[%s399_s3 + $0x8] sm:$0xff] %vm67_vm0, %v232_v34 }
  0x3d   :  { %239 = vsyncpa [#allocation3], 1 }
  0x3e   :  { %240 = vsyncpa [#allocation5], 1 }

</bundles_post_ra>
